<compile_context>
chip_gen: v7x
topology: tpu7x:2x2x1
jax: 0.10.0
libtpu: 0.0.40
codegen_flags: <defaults>
</compile_context>

<pallas_src>
import functools

import jax
import jax.numpy as jnp
from jax.experimental import pallas as pl
from jax.experimental.pallas import tpu as pltpu


def _ntxent_kernel(zn_ref, loss_ref, corr_ref, *, tm, exp_dtype):
    """One grid step: TM consecutive rows of the concatenated (2N, D) matrix.

    zn_ref   : (2N, D) pre-normalized, pre-scaled by sqrt(1/temperature),
               already in the MXU dtype; VMEM resident (constant index_map).
    loss_ref : (1, 1, 1) partial sum of per-row CE losses for this block.
    corr_ref : (1, 1, 1) partial count of rows whose argmax == target.
    """
    i = pl.program_id(0)
    m = zn_ref.shape[0]              # 2N
    n = m // 2
    r0 = pl.multiple_of(i * tm, tm)  # first (global) row of this block

    zn = zn_ref[...]                           # (2N, D) column operand
    q = zn_ref[pl.ds(r0, tm), :]               # (TM, D) query block

    # Temperature-scaled logits straight off the MXU (sqrt(1/t) folded into
    # both operands in the wrapper), f32 accumulation.
    s = jax.lax.dot_general(q, zn, (((1,), (1,)), ((), ())),
                            preferred_element_type=jnp.float32)     # (TM, 2N)

    row_g = jax.lax.broadcasted_iota(jnp.int32, (tm, m), 0) + r0    # global row id
    col = jax.lax.broadcasted_iota(jnp.int32, (tm, m), 1)
    diag_mask = col == row_g                                        # self-similarity
    pos_col = jnp.where(row_g < n, row_g + n, row_g - n)            # positive pair
    pos_mask = col == pos_col

    neg_inf = jnp.float32(-jnp.inf)
    s = jnp.where(diag_mask, neg_inf, s)

    # Positive logit taken from the matmul output itself, so the accuracy
    # comparison below is exactly consistent with row_max.
    pos = jnp.sum(jnp.where(pos_mask, s, 0.0), axis=1, keepdims=True)   # (TM, 1)
    # Single max pass shared by the softmax and the argmax accuracy.
    row_max = jnp.max(s, axis=1, keepdims=True)                         # (TM, 1)

    shifted = s - row_max
    if jnp.dtype(exp_dtype) == jnp.dtype(jnp.float32):
        denom = jnp.sum(jnp.exp(shifted), axis=1, keepdims=True)
    else:
        # bf16 EUP path (v6e / v7x): ~2x transcendental throughput; f32 accumulate.
        denom = jnp.sum(jnp.exp(shifted.astype(exp_dtype)).astype(jnp.float32),
                        axis=1, keepdims=True)

    loss_rows = jnp.log(denom) + (row_max - pos)            # logsumexp - pos_logit
    correct_rows = (pos >= row_max).astype(jnp.float32)     # argmax == target

    loss_ref[...] = jnp.reshape(jnp.sum(loss_rows), (1, 1, 1))
    corr_ref[...] = jnp.reshape(jnp.sum(correct_rows), (1, 1, 1))


def _device_kind():
    try:
        return jax.devices()[0].device_kind.lower()
    except Exception:
        return ""


def ntxent_loss(z1, z2, temperature: float = 0.07, *, block_rows=None,
                mxu_dtype=jnp.bfloat16, exp_dtype=None, vmem_limit_bytes=None):
    """Pallas NT-Xent loss. z1, z2: (N, D). Returns (loss, correct)."""
    assert z1.shape == z2.shape and z1.ndim == 2
    N, D = z1.shape
    M = 2 * N
    kind = _device_kind()

    # ---- wrapper preprocessing (one fused mem-bound pass) --------------------
    # L2-normalize and fold sqrt(1/temperature) into the operands, so that the
    # in-kernel matmul directly yields cos_sim / temperature; cast once to the
    # MXU dtype (halves resident VMEM + cold HBM->VMEM DMA for bf16).
    z = jnp.concatenate([z1, z2], axis=0).astype(jnp.float32)           # (2N, D)
    ssq = jnp.sum(z * z, axis=-1, keepdims=True)
    scale = jax.lax.rsqrt(jnp.maximum(ssq, jnp.float32(1e-16)))         # 1e-8 norm clamp
    scale = scale * jnp.sqrt(jnp.float32(1.0 / temperature))
    zn = (z * scale).astype(mxu_dtype)

    # ---- tiling heuristics ----------------------------------------------------
    if block_rows is None:
        pref = 128 if ("v5" in kind or "v4" in kind or "v3" in kind) else 256
        cands = [c for c in (256, 128, 64, 32, 16, 8) if c <= pref]
        block_rows = next((c for c in cands if M % c == 0 and M // c >= 2), None)
        if block_rows is None:   # small / odd M: any divisor, else a single block
            block_rows = next((c for c in (256, 128, 64, 32, 16, 8) if M % c == 0), M)
    assert M % block_rows == 0, "block_rows must divide 2*N"
    grid = M // block_rows

    if exp_dtype is None:
        # v6e / v7x EUP has a bf16 path; v5e and older do not.
        exp_dtype = jnp.bfloat16 if ("v6" in kind or "v7" in kind) else jnp.float32

    # ---- VMEM budget ----------------------------------------------------------
    if vmem_limit_bytes is None:
        item = jnp.dtype(mxu_dtype).itemsize
        resident = M * D * item                          # zn (possibly double-buffered)
        per_step = 6 * block_rows * M * 4 + 2 * block_rows * D * item
        need = 2 * resident + per_step + (2 << 20)
        if need > 32 * 1024 * 1024:                      # default scoped limit
            vmem_limit_bytes = int(min(need, 100 * 1024 * 1024))
    # TODO(synk): for very large N*D (beyond v7x's 64 MiB VMEM) add a column-tiled
    # online-softmax (flash-style) variant instead of keeping (2N, D) resident.

    params = dict(dimension_semantics=("parallel",))
    if vmem_limit_bytes is not None:
        params["vmem_limit_bytes"] = int(vmem_limit_bytes)

    kernel = functools.partial(_ntxent_kernel, tm=block_rows, exp_dtype=exp_dtype)

    def _run(single_buffer_resident):
        if single_buffer_resident:
            # Block index never changes across the grid -> one resident copy.
            zn_spec = pl.BlockSpec((M, D), lambda i: (0, 0),
                                   pipeline_mode=pl.Buffered(1))
        else:
            zn_spec = pl.BlockSpec((M, D), lambda i: (0, 0))
        return pl.pallas_call(
            kernel,
            out_shape=(jax.ShapeDtypeStruct((grid, 1, 1), jnp.float32),
                       jax.ShapeDtypeStruct((grid, 1, 1), jnp.float32)),
            grid=(grid,),
            in_specs=[zn_spec],
            out_specs=(pl.BlockSpec((1, 1, 1), lambda i: (i, 0, 0)),
                       pl.BlockSpec((1, 1, 1), lambda i: (i, 0, 0))),
            compiler_params=pltpu.CompilerParams(**params),
        )(zn)

    try:
        partial_loss, partial_correct = _run(True)
    except Exception:
        # pl.Buffered(1) unsupported on this jax version -> default buffering.
        partial_loss, partial_correct = _run(False)

    loss = jnp.sum(partial_loss) / jnp.float32(M)
    correct = jnp.sum(partial_correct) / jnp.float32(2.0)
    return loss, correct


def _ntxent_reference(z1, z2, temperature: float = 0.07):
    """Plain-JAX reference mirroring the PyTorch module (true f32 matmul)."""
    z = jnp.concatenate([z1, z2], axis=0).astype(jnp.float32)
    M = z.shape[0]
    N = M // 2
    norm = jnp.maximum(jnp.linalg.norm(z, axis=-1, keepdims=True), 1e-8)
    zn = z / norm
    sim = jnp.einsum("id,jd->ij", zn, zn, precision=jax.lax.Precision.HIGHEST)
    sim = jnp.where(jnp.eye(M, dtype=bool), -jnp.inf, sim)
    targets = jnp.concatenate([jnp.arange(N, 2 * N), jnp.arange(0, N)])
    logits = sim / temperature
    lse = jax.scipy.special.logsumexp(logits, axis=1)
    tgt = logits[jnp.arange(M), targets]
    loss = jnp.mean(lse - tgt)
    correct = jnp.sum(jnp.argmax(sim, axis=1) == targets).astype(jnp.float32) / 2.0
    return loss, correct


if __name__ == "__main__":
    # module params: temperature=0.07 (buffer log_temperature = log(0.07)),
    # learn_temperature=False
    temperature = 0.07

    N, D = 16, 32
    key = jax.random.PRNGKey(0)
    k1, k2 = jax.random.split(key)
    z1 = jax.random.normal(k1, (N, D), dtype=jnp.float32)
    z2 = jax.random.normal(k2, (N, D), dtype=jnp.float32)

    ref_loss, ref_correct = _ntxent_reference(z1, z2, temperature)

    # Exact-precision path (f32 MXU operands + f32 exp); block_rows=8 -> 4 grid
    # steps to exercise the tiled / partial-output path.
    loss32, correct32 = ntxent_loss(z1, z2, temperature, block_rows=8,
                                    mxu_dtype=jnp.float32, exp_dtype=jnp.float32)
    jax.block_until_ready((loss32, correct32))
    assert jnp.allclose(loss32, ref_loss, atol=2e-3, rtol=1e-3), (loss32, ref_loss)
    assert jnp.allclose(correct32, ref_correct), (correct32, ref_correct)

    # Fast path: defaults (bf16 MXU operands, auto exp dtype, auto block_rows)
    # -- looser tolerance for the bf16 similarity tiles.
    loss_fast, correct_fast = ntxent_loss(z1, z2, temperature)
    jax.block_until_ready((loss_fast, correct_fast))
    assert jnp.allclose(loss_fast, ref_loss, atol=7e-2, rtol=7e-2), (loss_fast, ref_loss)
    assert jnp.abs(correct_fast - ref_correct) <= 1.5, (correct_fast, ref_correct)

    print("KERNEL_OK")
</pallas_src>

<mosaic_0001>
module attributes {stable_mosaic.version = 11 : i64} {
  func.func @_ntxent_kernel(%arg0: i32, %arg1: memref<32x32xf32, #tpu.memory_space<vmem>>, %arg2: memref<1x1x1xf32, #tpu.memory_space<vmem>>, %arg3: memref<1x1x1xf32, #tpu.memory_space<vmem>>) attributes {dimension_semantics = [#tpu.dimension_semantics<parallel>], iteration_bounds = array<i64: 4>, scalar_prefetch = 0 : i64, scratch_operands = 0 : i64, tpu.core_type = #tpu.core_type<tc>, window_params = [{pipeline_mode = #tpu.pipeline_mode<synchronous>, transform_indices = @transform_0, window_bounds = array<i64: 32, 32>}, {transform_indices = @transform_1, window_bounds = array<i64: 1, 1, 1>}, {transform_indices = @transform_2, window_bounds = array<i64: 1, 1, 1>}]} {
    %c8_i32 = arith.constant 8 : i32
    %0 = arith.muli %arg0, %c8_i32 : i32
    %1 = tpu.assume_multiple %0, 8 : i32
    %c0 = arith.constant 0 : index
    %c0_0 = arith.constant 0 : index
    %2 = vector.load %arg1[%c0, %c0_0] : memref<32x32xf32, #tpu.memory_space<vmem>>, vector<32x32xf32>
    %3 = arith.index_cast %1 : i32 to index
    %c0_1 = arith.constant 0 : index
    %4 = vector.load %arg1[%3, %c0_1] : memref<32x32xf32, #tpu.memory_space<vmem>>, vector<8x32xf32>
    %cst = arith.constant dense<0.000000e+00> : vector<8x32xf32>
    %5 = tpu.matmul %4, %2, %cst {dimension_numbers = #tpu.dot_dimension_numbers<[1], [1], [0], [0], [0, 0, 1, 0], [], []>} : vector<8x32xf32>, vector<32x32xf32>, vector<8x32xf32> -> vector<8x32xf32>
    %6 = tpu.iota {dimensions = array<i32: 0>} : vector<8x32xi32>
    %7 = vector.broadcast %1 : i32 to vector<8x32xi32>
    %8 = arith.addi %6, %7 : vector<8x32xi32>
    %9 = tpu.iota {dimensions = array<i32: 1>} : vector<8x32xi32>
    %10 = arith.cmpi eq, %9, %8 : vector<8x32xi32>
    %c16_i32 = arith.constant 16 : i32
    %11 = vector.broadcast %c16_i32 : i32 to vector<8x32xi32>
    %12 = arith.cmpi slt, %8, %11 : vector<8x32xi32>
    %c16_i32_2 = arith.constant 16 : i32
    %13 = vector.broadcast %c16_i32_2 : i32 to vector<8x32xi32>
    %14 = arith.addi %8, %13 : vector<8x32xi32>
    %c16_i32_3 = arith.constant 16 : i32
    %15 = vector.broadcast %c16_i32_3 : i32 to vector<8x32xi32>
    %16 = arith.subi %8, %15 : vector<8x32xi32>
    %17 = arith.select %12, %14, %16 : vector<8x32xi1>, vector<8x32xi32>
    %18 = arith.cmpi eq, %9, %17 : vector<8x32xi32>
    %cst_4 = arith.constant 0xFF800000 : f32
    %19 = vector.broadcast %cst_4 : f32 to vector<8x32xf32>
    %20 = arith.select %10, %19, %5 : vector<8x32xi1>, vector<8x32xf32>
    %cst_5 = arith.constant 0.000000e+00 : f32
    %21 = vector.broadcast %cst_5 : f32 to vector<8x32xf32>
    %22 = arith.select %18, %20, %21 : vector<8x32xi1>, vector<8x32xf32>
    %cst_6 = arith.constant dense<0.000000e+00> : vector<8xf32>
    %23 = vector.multi_reduction <add>, %22, %cst_6 [1] : vector<8x32xf32> to vector<8xf32>
    %24 = vector.shape_cast %23 : vector<8xf32> to vector<8x1xf32>
    %cst_7 = arith.constant dense<0xFF800000> : vector<8xf32>
    %25 = vector.multi_reduction <maximumf>, %20, %cst_7 [1] : vector<8x32xf32> to vector<8xf32>
    %26 = vector.shape_cast %25 : vector<8xf32> to vector<8x1xf32>
    %27 = vector.broadcast %26 : vector<8x1xf32> to vector<8x32xf32>
    %28 = arith.subf %20, %27 : vector<8x32xf32>
    %29 = math.exp %28 : vector<8x32xf32>
    %cst_8 = arith.constant dense<0.000000e+00> : vector<8xf32>
    %30 = vector.multi_reduction <add>, %29, %cst_8 [1] : vector<8x32xf32> to vector<8xf32>
    %31 = vector.shape_cast %30 : vector<8xf32> to vector<8x1xf32>
    %32 = math.log %31 : vector<8x1xf32>
    %33 = arith.subf %26, %24 : vector<8x1xf32>
    %34 = arith.addf %32, %33 : vector<8x1xf32>
    %35 = arith.cmpf oge, %24, %26 : vector<8x1xf32>
    %36 = arith.extui %35 : vector<8x1xi1> to vector<8x1xi32>
    %37 = arith.sitofp %36 : vector<8x1xi32> to vector<8x1xf32>
    %38 = vector.shape_cast %34 : vector<8x1xf32> to vector<1x8x1xf32>
    %cst_9 = arith.constant dense<0.000000e+00> : vector<1xf32>
    %39 = vector.multi_reduction <add>, %38, %cst_9 [1, 2] : vector<1x8x1xf32> to vector<1xf32>
    %40 = vector.shape_cast %39 : vector<1xf32> to vector<1x1x1xf32>
    %41 = vector.extract %40[0, 0, 0] : f32 from vector<1x1x1xf32>
    %42 = vector.broadcast %41 : f32 to vector<1x1x1xf32>
    %c0_10 = arith.constant 0 : index
    %c0_11 = arith.constant 0 : index
    %c0_12 = arith.constant 0 : index
    %43 = vector.load %arg2[%c0_10, %c0_11, %c0_12] : memref<1x1x1xf32, #tpu.memory_space<vmem>>, vector<1x1x1xf32>
    tpu.vector_store %arg2[%c0_10, %c0_11, %c0_12], %42 {strides = array<i32>} : memref<1x1x1xf32, #tpu.memory_space<vmem>>, vector<1x1x1xf32>,
    %44 = vector.shape_cast %37 : vector<8x1xf32> to vector<1x8x1xf32>
    %cst_13 = arith.constant dense<0.000000e+00> : vector<1xf32>
    %45 = vector.multi_reduction <add>, %44, %cst_13 [1, 2] : vector<1x8x1xf32> to vector<1xf32>
    %46 = vector.shape_cast %45 : vector<1xf32> to vector<1x1x1xf32>
    %47 = vector.extract %46[0, 0, 0] : f32 from vector<1x1x1xf32>
    %48 = vector.broadcast %47 : f32 to vector<1x1x1xf32>
    %c0_14 = arith.constant 0 : index
    %c0_15 = arith.constant 0 : index
    %c0_16 = arith.constant 0 : index
    %49 = vector.load %arg3[%c0_14, %c0_15, %c0_16] : memref<1x1x1xf32, #tpu.memory_space<vmem>>, vector<1x1x1xf32>
    tpu.vector_store %arg3[%c0_14, %c0_15, %c0_16], %48 {strides = array<i32>} : memref<1x1x1xf32, #tpu.memory_space<vmem>>, vector<1x1x1xf32>,
    return
  }
  func.func @transform_0(%arg0: i32) -> (i32, i32) {
    %c0_i32 = arith.constant 0 : i32
    %c0_i32_0 = arith.constant 0 : i32
    %c0_i32_1 = arith.constant 0 : i32
    return %c0_i32, %c0_i32_0 : i32, i32
  }
  func.func @transform_1(%arg0: i32) -> (i32, i32, i32) {
    %c0_i32 = arith.constant 0 : i32
    %c0_i32_0 = arith.constant 0 : i32
    %c0_i32_1 = arith.constant 0 : i32
    return %arg0, %c0_i32, %c0_i32_0 : i32, i32, i32
  }
  func.func @transform_2(%arg0: i32) -> (i32, i32, i32) {
    %c0_i32 = arith.constant 0 : i32
    %c0_i32_0 = arith.constant 0 : i32
    %c0_i32_1 = arith.constant 0 : i32
    return %arg0, %c0_i32, %c0_i32_0 : i32, i32, i32
  }
}

module attributes {stable_mosaic.version = 11 : i64} {
  func.func @_ntxent_kernel(%arg0: i32, %arg1: memref<32x32xf32, #tpu.memory_space<vmem>>, %arg2: memref<1x1x1xf32, #tpu.memory_space<vmem>>, %arg3: memref<1x1x1xf32, #tpu.memory_space<vmem>>) attributes {dimension_semantics = [#tpu.dimension_semantics<parallel>], iteration_bounds = array<i64: 4>, scalar_prefetch = 0 : i64, scratch_operands = 0 : i64, tpu.core_type = #tpu.core_type<tc>, window_params = [{pipeline_mode = #tpu.pipeline_mode<synchronous>, transform_indices = @transform_0, window_bounds = array<i64: 32, 32>}, {transform_indices = @transform_1, window_bounds = array<i64: 1, 1, 1>}, {transform_indices = @transform_2, window_bounds = array<i64: 1, 1, 1>}]} {
    %c8_i32 = arith.constant 8 : i32
    %0 = arith.muli %arg0, %c8_i32 : i32
    %1 = tpu.assume_multiple %0, 8 : i32
    %c0 = arith.constant 0 : index
    %c0_0 = arith.constant 0 : index
    %2 = vector.load %arg1[%c0, %c0_0] : memref<32x32xf32, #tpu.memory_space<vmem>>, vector<32x32xf32>
    %3 = arith.index_cast %1 : i32 to index
    %c0_1 = arith.constant 0 : index
    %4 = vector.load %arg1[%3, %c0_1] : memref<32x32xf32, #tpu.memory_space<vmem>>, vector<8x32xf32>
    %cst = arith.constant dense<0.000000e+00> : vector<8x32xf32>
    %5 = tpu.matmul %4, %2, %cst {dimension_numbers = #tpu.dot_dimension_numbers<[1], [1], [0], [0], [0, 0, 1, 0], [], []>} : vector<8x32xf32>, vector<32x32xf32>, vector<8x32xf32> -> vector<8x32xf32>
    %6 = tpu.iota {dimensions = array<i32: 0>} : vector<8x32xi32>
    %7 = vector.broadcast %1 : i32 to vector<8x32xi32>
    %8 = arith.addi %6, %7 : vector<8x32xi32>
    %9 = tpu.iota {dimensions = array<i32: 1>} : vector<8x32xi32>
    %10 = arith.cmpi eq, %9, %8 : vector<8x32xi32>
    %c16_i32 = arith.constant 16 : i32
    %11 = vector.broadcast %c16_i32 : i32 to vector<8x32xi32>
    %12 = arith.cmpi slt, %8, %11 : vector<8x32xi32>
    %c16_i32_2 = arith.constant 16 : i32
    %13 = vector.broadcast %c16_i32_2 : i32 to vector<8x32xi32>
    %14 = arith.addi %8, %13 : vector<8x32xi32>
    %c16_i32_3 = arith.constant 16 : i32
    %15 = vector.broadcast %c16_i32_3 : i32 to vector<8x32xi32>
    %16 = arith.subi %8, %15 : vector<8x32xi32>
    %17 = arith.select %12, %14, %16 : vector<8x32xi1>, vector<8x32xi32>
    %18 = arith.cmpi eq, %9, %17 : vector<8x32xi32>
    %cst_4 = arith.constant 0xFF800000 : f32
    %19 = vector.broadcast %cst_4 : f32 to vector<8x32xf32>
    %20 = arith.select %10, %19, %5 : vector<8x32xi1>, vector<8x32xf32>
    %cst_5 = arith.constant 0.000000e+00 : f32
    %21 = vector.broadcast %cst_5 : f32 to vector<8x32xf32>
    %22 = arith.select %18, %20, %21 : vector<8x32xi1>, vector<8x32xf32>
    %cst_6 = arith.constant dense<0.000000e+00> : vector<8xf32>
    %23 = vector.multi_reduction <add>, %22, %cst_6 [1] : vector<8x32xf32> to vector<8xf32>
    %24 = vector.shape_cast %23 : vector<8xf32> to vector<8x1xf32>
    %cst_7 = arith.constant dense<0xFF800000> : vector<8xf32>
    %25 = vector.multi_reduction <maximumf>, %20, %cst_7 [1] : vector<8x32xf32> to vector<8xf32>
    %26 = vector.shape_cast %25 : vector<8xf32> to vector<8x1xf32>
    %27 = vector.broadcast %26 : vector<8x1xf32> to vector<8x32xf32>
    %28 = arith.subf %20, %27 : vector<8x32xf32>
    %29 = math.exp %28 : vector<8x32xf32>
    %cst_8 = arith.constant dense<0.000000e+00> : vector<8xf32>
    %30 = vector.multi_reduction <add>, %29, %cst_8 [1] : vector<8x32xf32> to vector<8xf32>
    %31 = vector.shape_cast %30 : vector<8xf32> to vector<8x1xf32>
    %32 = math.log %31 : vector<8x1xf32>
    %33 = arith.subf %26, %24 : vector<8x1xf32>
    %34 = arith.addf %32, %33 : vector<8x1xf32>
    %35 = arith.cmpf oge, %24, %26 : vector<8x1xf32>
    %36 = arith.extui %35 : vector<8x1xi1> to vector<8x1xi32>
    %37 = arith.sitofp %36 : vector<8x1xi32> to vector<8x1xf32>
    %38 = vector.shape_cast %34 : vector<8x1xf32> to vector<1x8x1xf32>
    %cst_9 = arith.constant dense<0.000000e+00> : vector<1xf32>
    %39 = vector.multi_reduction <add>, %38, %cst_9 [1, 2] : vector<1x8x1xf32> to vector<1xf32>
    %40 = vector.shape_cast %39 : vector<1xf32> to vector<1x1x1xf32>
    %41 = vector.extract %40[0, 0, 0] : f32 from vector<1x1x1xf32>
    %42 = vector.broadcast %41 : f32 to vector<1x1x1xf32>
    %c0_10 = arith.constant 0 : index
    %c0_11 = arith.constant 0 : index
    %c0_12 = arith.constant 0 : index
    %43 = vector.load %arg2[%c0_10, %c0_11, %c0_12] : memref<1x1x1xf32, #tpu.memory_space<vmem>>, vector<1x1x1xf32>
    tpu.vector_store %arg2[%c0_10, %c0_11, %c0_12], %42 {strides = array<i32>} : memref<1x1x1xf32, #tpu.memory_space<vmem>>, vector<1x1x1xf32>,
    %44 = vector.shape_cast %37 : vector<8x1xf32> to vector<1x8x1xf32>
    %cst_13 = arith.constant dense<0.000000e+00> : vector<1xf32>
    %45 = vector.multi_reduction <add>, %44, %cst_13 [1, 2] : vector<1x8x1xf32> to vector<1xf32>
    %46 = vector.shape_cast %45 : vector<1xf32> to vector<1x1x1xf32>
    %47 = vector.extract %46[0, 0, 0] : f32 from vector<1x1x1xf32>
    %48 = vector.broadcast %47 : f32 to vector<1x1x1xf32>
    %c0_14 = arith.constant 0 : index
    %c0_15 = arith.constant 0 : index
    %c0_16 = arith.constant 0 : index
    %49 = vector.load %arg3[%c0_14, %c0_15, %c0_16] : memref<1x1x1xf32, #tpu.memory_space<vmem>>, vector<1x1x1xf32>
    tpu.vector_store %arg3[%c0_14, %c0_15, %c0_16], %48 {strides = array<i32>} : memref<1x1x1xf32, #tpu.memory_space<vmem>>, vector<1x1x1xf32>,
    return
  }
  func.func @transform_0(%arg0: i32) -> (i32, i32) {
    %c0_i32 = arith.constant 0 : i32
    %c0_i32_0 = arith.constant 0 : i32
    %c0_i32_1 = arith.constant 0 : i32
    return %c0_i32, %c0_i32_0 : i32, i32
  }
  func.func @transform_1(%arg0: i32) -> (i32, i32, i32) {
    %c0_i32 = arith.constant 0 : i32
    %c0_i32_0 = arith.constant 0 : i32
    %c0_i32_1 = arith.constant 0 : i32
    return %arg0, %c0_i32, %c0_i32_0 : i32, i32, i32
  }
  func.func @transform_2(%arg0: i32) -> (i32, i32, i32) {
    %c0_i32 = arith.constant 0 : i32
    %c0_i32_0 = arith.constant 0 : i32
    %c0_i32_1 = arith.constant 0 : i32
    return %arg0, %c0_i32, %c0_i32_0 : i32, i32, i32
  }
}

</mosaic_0001>

<bundles_post_ra>
// kernel: tpu_custom_call.1
= control target key start
LH: loop header
LB: loop body
LE: loop exit
PB: predicated region body
PF: predicated region fallthrough
CT: control target
= control target key end

     0   :  { %8 = vsyncpa [#allocation3], 0  ;;  %s503_s9 = smov 0   ;;  %s566_s0 = inlined_call_operand.hbm [shape: f32[32,32], index: 0, kind: input, shape index: {}]   ;;  %s567_s1 = inlined_call_operand.vmem [shape: f32[4,1,1], index: 1, kind: output, shape index: {0}]   ;;  %s568_s2 = inlined_call_operand.vmem [shape: f32[4,1,1], index: 2, kind: output, shape index: {1}]  }
   0x1 LB: > { %s509_s10 = sadd.s32 4294967295, %s480_s9   ;;  %p372_p0 = scmp.ge.s32.totalorder %s480_s9, 1  ;;  %s480_s9 = sphi %s503_s9, %s14_s9  }
   0x2   : > { %p92_p1 = scmp.lt.s32.totalorder %s480_s9, 5  ;;  %s482_s11 = smov [#allocation2]  }
   0x3   : > { %s104_s12 = sshll.u32 %s482_s11, 4  ;;  %p569_p3 = scmp.eq.s32.totalorder %s509_s10, 0  ;;  %s105_s12 = int_to_ptr.vmem [resolvable:$true] %s104_s12 }
   0x4   : > { %p513_p2 = pnand %p372_p0, %p92_p1  ;;  %s442_s17 = scalar_lea.hbm %s566_s0, 512 }
   0x5   : > { %p443_p6 = scmp.ne.s32.totalorder %s566_s0, %s442_s17  ;;  %p449_p10 = scmp.lt.u32.totalorder %s442_s17, %s566_s0 }
   0x6   : > { %s571_s13 = scalar_select %p513_p2, 1, 0 }
   0x7   : > { %p418_p4 = pneg %p513_p2 }
   0x9   : > { %p522_p5 = pnand %p569_p3, %p418_p4 }
   0xb   : > { %p444_p7 = pneg %p522_p5 }
   0xd   : > { %p445_p8 = pnand %p444_p7, %p443_p6 }
   0xf   : > { %p446_p9 = pneg %p445_p8 }
  0x11   : > { %p451_p11 = pnand %p449_p10, %p446_p9 }
  0x13   : > { %454 = shalt.err (!%p451_p11)
}
  0x14   : > { %s455_s22 = scalar_lea.vmem %s105_s12, 512  ;;  %p463_p1 = scmp.lt.s32.totalorder %s105_s12, %s105_s12 }
  0x15   : > { %p456_p12 = scmp.ne.s32.totalorder %s105_s12, %s455_s22  ;;  %p464_p4 = scmp.lt.s32.totalorder %s455_s22, %s455_s22 }
  0x17   : > { %p458_p13 = pnand %p456_p12, %p444_p7  ;;  %p465_p3 = por %p464_p4, %p463_p1 }
  0x19   : > { %p459_p0 = pneg %p458_p13 }
  0x1b   : > { %p466_p2 = pnand %p465_p3, %p459_p0 }
  0x1d   : > { %469 = shalt.err (!%p466_p2)
}
  0x1e   : > { %s483_s23 = smov 128   ;;  %s484_s24 = smov 8  }
  0x1f   : > { %421 = dma.hbm_to_vmem [thread:$0]  (!%p522_p5), %s566_s0, 512, %s105_s12, [#allocation3], %s483_s23, %s483_s23, %s484_s24  }
  0x20   : > { %p573_p6 = scmp.ne.s32.totalorder %s571_s13, 0 }
  0x21   : > { %p574_p8 = scmp.eq.s32.totalorder (!%p573_p6), %s509_s10, 0 }
  0x22   : > { %120 = sbr.rel (%p573_p6) target bundleno = 797 (0x31d), region = 24 }
  0x29   : > { %475 = dma.done.wait (%p574_p8), [#allocation3], 512   ;;  %p575_p7 = pmov %p574_p8 }
  0x2a   : > { %v485_v0 = vmov 0.0|0.0   ;;  %vm486_vm0 = vmmov 0   ;;  %v487_v1 = vmov 0.0   ;;  %vm151_vm1 = vcmask 261120   ;;  %v145_v2 = vld [vmem:[#allocation2] sm:$0xff]  ;;  %v146_v3 = vld [vmem:[#allocation2 + $0x8] sm:$0xff] }
  0x2b   : > { %477 = vsyncadd (%p575_p7), [#allocation3], 4294966784  ;;  %402 = vmatprep.subr.bf16.mxu0 %v485_v0  ;;  %399 = vmatprep.mubr.msk.f32.mxu0 %vm486_vm0, %v487_v1  ;;  %v403_v4 = vpack.c.bf16 %v146_v3, %v145_v2  ;;  %v147_v5 = vld [vmem:[#allocation2 + $0x10] sm:$0xff]  ;;  %v148_v6 = vld [vmem:[#allocation2 + $0x18] sm:$0xff]  ;;  %s376_s27 = sshll.u32 %s509_s10, 3  ;;  %v237_v9 = vlaneseq  ;;  %vm270_vm7 = vcmask 7168  }
  0x2c   : > { %vm404_vm2 = vmpackc.low %vm151_vm1, %vm151_vm1  ;;  %v407_v7 = vpack.c.bf16 %v148_v6, %v147_v5  ;;  %s149_s28 = scalar_lea.vmem [#allocation2], %s376_s27  ;;  %v239_v11 = vstv %s376_s27  ;;  %p138_p2 = scmp.lt.s32.totalorder %s509_s10, 3  ;;  %vm282_vm8 = vcmask 0  }
  0x2d   : > { %405 = vmatpush3.bf16.xpose.msk.msra.mxu0 %vm404_vm2, %v403_v4  ;;  %v150_v8 = vld [vmem:[%s149_s28] sm:$0xff]  ;;  %v238_v10 = vshrl.u32 %v237_v9, 7  ;;  %v242_v15 = vand.u32 127, %v237_v9 }
  0x2e   : > { %406 = vmatprep.subr.bf16.mxu0 %v485_v0  ;;  %s577_s10 = smov (!%p138_p2, %s509_s10), 3 }
  0x2f   : > { %v240_v12 = vadd.s32 %v239_v11, %v238_v10  ;;  %s140_s3 = scalar_lea.vmem %s567_s1, %s577_s10  ;;  %s143_s7 = scalar_lea.vmem %s568_s2, %s577_s10 }
  0x31   : > { %v245_v13 = vadd.s32 16, %v240_v12  ;;  %v382_v14 = vadd.s32 4294967280, %v240_v12  ;;  %vm244_vm3 = vcmp.lt.s32.totalorder %v240_v12, 16  ;;  %vm243_vm4 = vcmp.eq.s32.totalorder %v242_v15, %v240_v12 }
  0x33   : > { %v247_v16 = vsel %vm244_vm3, %v245_v13, %v382_v14 }
  0x34   : > { %vm248_vm5 = vcmp.eq.s32.totalorder %v242_v15, %v247_v16 }
  0x35   : > { %409 = vmatpush3.bf16.xpose.msk.msra.mxu0 %vm404_vm2, %v407_v7 }
  0x3c   : > { %400 = vmatmul.mubr.msk.f32.vlgmr.msra.gmra.mrb[0].mxu0 %vm151_vm1, %v150_v8 }
 0x10f   : > { %v233_v17 = vpop.f32.mrb[0].mxu0 }
 0x110   : > { %v249_v18 = vsel %vm243_vm4, -inf, %v233_v17  ;;  %v401_v19 = vpop.f32.mrb[1].mxu0 }
 0x111   : > { %v254_v20 = vsel %vm151_vm1, %v249_v18, -inf  ;;  %v250_v21 = vsel %vm248_vm5, %v249_v18, 0.0 }
 0x112   : > { %255 = vmax.xlane.f32.xlu0 %v254_v20  ;;  %v251_v22 = vsel %vm151_vm1, %v250_v21, 0.0 }
 0x113   : > { %252 = vadd.xlane.f32.xlu1 %v251_v22 }
 0x19f   : > { %v256_v23 = vpop.xlane.xlu0 %255 }
 0x1a0   : > { %v257_v24 = vsub.f32 %v249_v18, %v256_v23  ;;  %v253_v26 = vpop.xlane.xlu1 %252 }
 0x1a1   : > { %vm267_vm6 = vcmp.ge.f32.partialorder %v253_v26, %v256_v23  ;;  %v265_v33 = vsub.f32 %v256_v23, %v253_v26 }
 0x1a2   : > { %v258_v25 = vmul.f32 1.442695, %v257_v24  ;;  %v383_v29 = vsel %vm267_vm6, 1.0, %v487_v1 }
 0x1a3   : > { %v284_v30 = vsel %vm270_vm7, %v383_v29, 0.0 }
 0x1a4   : > { %438 = vpow2.f32 %v258_v25 }
 0x1ae   : > { %v439_v27 = vpop.eup %438 }
 0x1af   : > { %v260_v28 = vsel %vm151_vm1, %v439_v27, 0.0 }
 0x1b0   : > { %261 = vadd.xlane.f32.xlu0 %v260_v28 }
 0x1b4   : > { %285 = vadd.xlane.f32.xlu0 %v284_v30 }
 0x23d   : > { %v262_v31 = vpop.xlane.xlu0 %261 }
 0x23e   : > { %440 = vlog2.f32 %v262_v31 }
 0x241   : > { %v286_v37 = vpop.xlane.xlu0 %285 }
 0x242   : > { %v287_v38 = vrot.slane %v286_v37, 4 }
 0x244   : > { %v288_v39 = vadd.f32 %v287_v38, %v286_v37 }
 0x246   : > { %v289_v40 = vrot.slane %v288_v39, 2 }
 0x248   : > { %v441_v32 = vpop.eup %440  ;;  %v290_v44 = vadd.f32 %v289_v40, %v288_v39 }
 0x249   : > { %v264_v34 = vmul.f32 0.6931472, %v441_v32 }
 0x24a   : > { %v291_v47 = vrot.slane %v290_v44, 1 }
 0x24b   : > { %v266_v35 = vadd.f32 %v265_v33, %v264_v34 }
 0x24c   : > { %v292_v50 = vadd.f32 %v291_v47, %v290_v44 }
 0x24d   : > { %v271_v36 = vsel %vm270_vm7, %v266_v35, 0.0 }
 0x24e   : > { %272 = vadd.xlane.f32.xlu1 %v271_v36 }
 0x2db   : > { %v273_v41 = vpop.xlane.xlu1 %272 }
 0x2dc   : > { %v274_v42 = vrot.slane %v273_v41, 4 }
 0x2de   : > { %v275_v43 = vadd.f32 %v274_v42, %v273_v41 }
 0x2e0   : > { %v276_v45 = vrot.slane %v275_v43, 2 }
 0x2e2   : > { %v277_v46 = vadd.f32 %v276_v45, %v275_v43 }
 0x2e4   : > { %v278_v48 = vrot.slane %v277_v46, 1 }
 0x2e6   : > { %v279_v49 = vadd.f32 %v278_v48, %v277_v46 }
 0x2e8   : > { %410 = vpush %v279_v49 }
 0x2e9   : > { %412 = vpush %v292_v50 }
 0x319   : > { %s411_s4 = spop %410 }
 0x31a   : > { %v281_v51 = vstv %s411_s4  ;;  %s413_s8 = spop %412 }
 0x31b   : > { %283 = vst.msk [vmem:[%s140_s3] sm:$0x1] %vm282_vm8, %v281_v51  ;;  %v294_v52 = vstv %s413_s8 }
 0x31c   : > { %295 = vst.msk [vmem:[%s143_s7] sm:$0x1] %vm282_vm8, %v294_v52 }
 0x31d PF: > { %s14_s9 = sadd.s32 1, %s480_s9  }
 0x31e   : > { %p11_p3 = scmp.ge.s32.totalorder %s14_s9, 6  }
 0x320   :  { %13 = sbr.rel (!%p11_p3) target bundleno = 1 (0x1), region = 69 }
 0x327   :  { %325 = vsyncpa [#allocation3], 1 }
 0x328   :  { %327 = vsyncpa [#allocation3 + $0x1], 1 }

// kernel: tpu_custom_call.1
= control target key start
LH: loop header
LB: loop body
LE: loop exit
PB: predicated region body
PF: predicated region fallthrough
CT: control target
= control target key end

     0   :  { %8 = vsyncpa [#allocation3], 0  ;;  %s503_s9 = smov 0   ;;  %s566_s0 = inlined_call_operand.hbm [shape: f32[32,32], index: 0, kind: input, shape index: {}]   ;;  %s567_s1 = inlined_call_operand.vmem [shape: f32[4,1,1], index: 1, kind: output, shape index: {0}]   ;;  %s568_s2 = inlined_call_operand.vmem [shape: f32[4,1,1], index: 2, kind: output, shape index: {1}]  }
   0x1 LB: > { %s509_s10 = sadd.s32 4294967295, %s480_s9   ;;  %p372_p0 = scmp.ge.s32.totalorder %s480_s9, 1  ;;  %s480_s9 = sphi %s503_s9, %s14_s9  }
   0x2   : > { %p92_p1 = scmp.lt.s32.totalorder %s480_s9, 5  ;;  %s482_s11 = smov [#allocation2]  }
   0x3   : > { %s104_s12 = sshll.u32 %s482_s11, 4  ;;  %p569_p3 = scmp.eq.s32.totalorder %s509_s10, 0  ;;  %s105_s12 = int_to_ptr.vmem [resolvable:$true] %s104_s12 }
   0x4   : > { %p513_p2 = pnand %p372_p0, %p92_p1  ;;  %s442_s17 = scalar_lea.hbm %s566_s0, 512 }
   0x5   : > { %p443_p6 = scmp.ne.s32.totalorder %s566_s0, %s442_s17  ;;  %p449_p10 = scmp.lt.u32.totalorder %s442_s17, %s566_s0 }
   0x6   : > { %s571_s13 = scalar_select %p513_p2, 1, 0 }
   0x7   : > { %p418_p4 = pneg %p513_p2 }
   0x9   : > { %p522_p5 = pnand %p569_p3, %p418_p4 }
   0xb   : > { %p444_p7 = pneg %p522_p5 }
   0xd   : > { %p445_p8 = pnand %p444_p7, %p443_p6 }
   0xf   : > { %p446_p9 = pneg %p445_p8 }
  0x11   : > { %p451_p11 = pnand %p449_p10, %p446_p9 }
  0x13   : > { %454 = shalt.err (!%p451_p11)
}
  0x14   : > { %s455_s22 = scalar_lea.vmem %s105_s12, 512  ;;  %p463_p1 = scmp.lt.s32.totalorder %s105_s12, %s105_s12 }
  0x15   : > { %p456_p12 = scmp.ne.s32.totalorder %s105_s12, %s455_s22  ;;  %p464_p4 = scmp.lt.s32.totalorder %s455_s22, %s455_s22 }
  0x17   : > { %p458_p13 = pnand %p456_p12, %p444_p7  ;;  %p465_p3 = por %p464_p4, %p463_p1 }
  0x19   : > { %p459_p0 = pneg %p458_p13 }
  0x1b   : > { %p466_p2 = pnand %p465_p3, %p459_p0 }
  0x1d   : > { %469 = shalt.err (!%p466_p2)
}
  0x1e   : > { %s483_s23 = smov 128   ;;  %s484_s24 = smov 8  }
  0x1f   : > { %421 = dma.hbm_to_vmem [thread:$0]  (!%p522_p5), %s566_s0, 512, %s105_s12, [#allocation3], %s483_s23, %s483_s23, %s484_s24  }
  0x20   : > { %p573_p6 = scmp.ne.s32.totalorder %s571_s13, 0 }
  0x21   : > { %p574_p8 = scmp.eq.s32.totalorder (!%p573_p6), %s509_s10, 0 }
  0x22   : > { %120 = sbr.rel (%p573_p6) target bundleno = 797 (0x31d), region = 24 }
  0x29   : > { %475 = dma.done.wait (%p574_p8), [#allocation3], 512   ;;  %p575_p7 = pmov %p574_p8 }
  0x2a   : > { %v485_v0 = vmov 0.0|0.0   ;;  %vm486_vm0 = vmmov 0   ;;  %v487_v1 = vmov 0.0   ;;  %vm151_vm1 = vcmask 261120   ;;  %v145_v2 = vld [vmem:[#allocation2] sm:$0xff]  ;;  %v146_v3 = vld [vmem:[#allocation2 + $0x8] sm:$0xff] }
  0x2b   : > { %477 = vsyncadd (%p575_p7), [#allocation3], 4294966784  ;;  %402 = vmatprep.subr.bf16.mxu0 %v485_v0  ;;  %399 = vmatprep.mubr.msk.f32.mxu0 %vm486_vm0, %v487_v1  ;;  %v403_v4 = vpack.c.bf16 %v146_v3, %v145_v2  ;;  %v147_v5 = vld [vmem:[#allocation2 + $0x10] sm:$0xff]  ;;  %v148_v6 = vld [vmem:[#allocation2 + $0x18] sm:$0xff]  ;;  %s376_s27 = sshll.u32 %s509_s10, 3  ;;  %v237_v9 = vlaneseq  ;;  %vm270_vm7 = vcmask 7168  }
  0x2c   : > { %vm404_vm2 = vmpackc.low %vm151_vm1, %vm151_vm1  ;;  %v407_v7 = vpack.c.bf16 %v148_v6, %v147_v5  ;;  %s149_s28 = scalar_lea.vmem [#allocation2], %s376_s27  ;;  %v239_v11 = vstv %s376_s27  ;;  %p138_p2 = scmp.lt.s32.totalorder %s509_s10, 3  ;;  %vm282_vm8 = vcmask 0  }
  0x2d   : > { %405 = vmatpush3.bf16.xpose.msk.msra.mxu0 %vm404_vm2, %v403_v4  ;;  %v150_v8 = vld [vmem:[%s149_s28] sm:$0xff]  ;;  %v238_v10 = vshrl.u32 %v237_v9, 7  ;;  %v242_v15 = vand.u32 127, %v237_v9 }
  0x2e   : > { %406 = vmatprep.subr.bf16.mxu0 %v485_v0  ;;  %s577_s10 = smov (!%p138_p2, %s509_s10), 3 }
  0x2f   : > { %v240_v12 = vadd.s32 %v239_v11, %v238_v10  ;;  %s140_s3 = scalar_lea.vmem %s567_s1, %s577_s10  ;;  %s143_s7 = scalar_lea.vmem %s568_s2, %s577_s10 }
  0x31   : > { %v245_v13 = vadd.s32 16, %v240_v12  ;;  %v382_v14 = vadd.s32 4294967280, %v240_v12  ;;  %vm244_vm3 = vcmp.lt.s32.totalorder %v240_v12, 16  ;;  %vm243_vm4 = vcmp.eq.s32.totalorder %v242_v15, %v240_v12 }
  0x33   : > { %v247_v16 = vsel %vm244_vm3, %v245_v13, %v382_v14 }
  0x34   : > { %vm248_vm5 = vcmp.eq.s32.totalorder %v242_v15, %v247_v16 }
  0x35   : > { %409 = vmatpush3.bf16.xpose.msk.msra.mxu0 %vm404_vm2, %v407_v7 }
  0x3c   : > { %400 = vmatmul.mubr.msk.f32.vlgmr.msra.gmra.mrb[0].mxu0 %vm151_vm1, %v150_v8 }
 0x10f   : > { %v233_v17 = vpop.f32.mrb[0].mxu0 }
 0x110   : > { %v249_v18 = vsel %vm243_vm4, -inf, %v233_v17  ;;  %v401_v19 = vpop.f32.mrb[1].mxu0 }
 0x111   : > { %v254_v20 = vsel %vm151_vm1, %v249_v18, -inf  ;;  %v250_v21 = vsel %vm248_vm5, %v249_v18, 0.0 }
 0x112   : > { %255 = vmax.xlane.f32.xlu0 %v254_v20  ;;  %v251_v22 = vsel %vm151_vm1, %v250_v21, 0.0 }
 0x113   : > { %252 = vadd.xlane.f32.xlu1 %v251_v22 }
 0x19f   : > { %v256_v23 = vpop.xlane.xlu0 %255 }
 0x1a0   : > { %v257_v24 = vsub.f32 %v249_v18, %v256_v23  ;;  %v253_v26 = vpop.xlane.xlu1 %252 }
 0x1a1   : > { %vm267_vm6 = vcmp.ge.f32.partialorder %v253_v26, %v256_v23  ;;  %v265_v33 = vsub.f32 %v256_v23, %v253_v26 }
 0x1a2   : > { %v258_v25 = vmul.f32 1.442695, %v257_v24  ;;  %v383_v29 = vsel %vm267_vm6, 1.0, %v487_v1 }
 0x1a3   : > { %v284_v30 = vsel %vm270_vm7, %v383_v29, 0.0 }
 0x1a4   : > { %438 = vpow2.f32 %v258_v25 }
 0x1ae   : > { %v439_v27 = vpop.eup %438 }
 0x1af   : > { %v260_v28 = vsel %vm151_vm1, %v439_v27, 0.0 }
 0x1b0   : > { %261 = vadd.xlane.f32.xlu0 %v260_v28 }
 0x1b4   : > { %285 = vadd.xlane.f32.xlu0 %v284_v30 }
 0x23d   : > { %v262_v31 = vpop.xlane.xlu0 %261 }
 0x23e   : > { %440 = vlog2.f32 %v262_v31 }
 0x241   : > { %v286_v37 = vpop.xlane.xlu0 %285 }
 0x242   : > { %v287_v38 = vrot.slane %v286_v37, 4 }
 0x244   : > { %v288_v39 = vadd.f32 %v287_v38, %v286_v37 }
 0x246   : > { %v289_v40 = vrot.slane %v288_v39, 2 }
 0x248   : > { %v441_v32 = vpop.eup %440  ;;  %v290_v44 = vadd.f32 %v289_v40, %v288_v39 }
 0x249   : > { %v264_v34 = vmul.f32 0.6931472, %v441_v32 }
 0x24a   : > { %v291_v47 = vrot.slane %v290_v44, 1 }
 0x24b   : > { %v266_v35 = vadd.f32 %v265_v33, %v264_v34 }
 0x24c   : > { %v292_v50 = vadd.f32 %v291_v47, %v290_v44 }
 0x24d   : > { %v271_v36 = vsel %vm270_vm7, %v266_v35, 0.0 }
 0x24e   : > { %272 = vadd.xlane.f32.xlu1 %v271_v36 }
 0x2db   : > { %v273_v41 = vpop.xlane.xlu1 %272 }
 0x2dc   : > { %v274_v42 = vrot.slane %v273_v41, 4 }
 0x2de   : > { %v275_v43 = vadd.f32 %v274_v42, %v273_v41 }
 0x2e0   : > { %v276_v45 = vrot.slane %v275_v43, 2 }
 0x2e2   : > { %v277_v46 = vadd.f32 %v276_v45, %v275_v43 }
 0x2e4   : > { %v278_v48 = vrot.slane %v277_v46, 1 }
 0x2e6   : > { %v279_v49 = vadd.f32 %v278_v48, %v277_v46 }
 0x2e8   : > { %410 = vpush %v279_v49 }
 0x2e9   : > { %412 = vpush %v292_v50 }
 0x319   : > { %s411_s4 = spop %410 }
 0x31a   : > { %v281_v51 = vstv %s411_s4  ;;  %s413_s8 = spop %412 }
 0x31b   : > { %283 = vst.msk [vmem:[%s140_s3] sm:$0x1] %vm282_vm8, %v281_v51  ;;  %v294_v52 = vstv %s413_s8 }
 0x31c   : > { %295 = vst.msk [vmem:[%s143_s7] sm:$0x1] %vm282_vm8, %v294_v52 }
 0x31d PF: > { %s14_s9 = sadd.s32 1, %s480_s9  }
 0x31e   : > { %p11_p3 = scmp.ge.s32.totalorder %s14_s9, 6  }
 0x320   :  { %13 = sbr.rel (!%p11_p3) target bundleno = 1 (0x1), region = 69 }
 0x327   :  { %325 = vsyncpa [#allocation3], 1 }
 0x328   :  { %327 = vsyncpa [#allocation3 + $0x1], 1 }

</bundles_post_ra>
